<compile_context>
chip_gen: v7x
topology: tpu7x:2x2x1
jax: 0.10.0
libtpu: 0.0.40
codegen_flags: <defaults>
</compile_context>

<pallas_src>
import jax
import jax.numpy as jnp
from jax.experimental import pallas as pl
from jax.experimental.pallas import tpu as pltpu


# ---------------------------------------------------------------------------
# Kernel (only used when a materialized copy is explicitly requested)
# ---------------------------------------------------------------------------
def _copy_kernel(x_ref, o_ref):
    # Identity copy of the current tile; element order is preserved.
    o_ref[...] = x_ref[...]


def _pallas_copy_2d(x2d, tile_rows, *, vmem_limit_bytes=None, donate_input=False):
    """Stream a (rows, cols) slab through VMEM, tiled along rows (cdiv grid)."""
    rows, cols = x2d.shape
    nbytes = rows * cols * jnp.dtype(x2d.dtype).itemsize
    grid = (pl.cdiv(rows, tile_rows),)  # ragged last block -> masked stores

    call_kwargs = {}
    if donate_input:
        # Caller guarantees the input buffer may be reused for the output.
        call_kwargs["input_output_aliases"] = {0: 0}

    return pl.pallas_call(
        _copy_kernel,
        out_shape=jax.ShapeDtypeStruct((rows, cols), x2d.dtype),
        grid_spec=pltpu.PrefetchScalarGridSpec(
            num_scalar_prefetch=0,
            grid=grid,
            in_specs=[pl.BlockSpec((tile_rows, cols), lambda i: (i, 0))],
            out_specs=pl.BlockSpec((tile_rows, cols), lambda i: (i, 0)),
        ),
        compiler_params=pltpu.CompilerParams(
            # Row blocks are independent -> shard across TensorCores (v7x).
            dimension_semantics=("parallel",),
            vmem_limit_bytes=vmem_limit_bytes,
        ),
        cost_estimate=pl.CostEstimate(
            flops=0, transcendentals=0, bytes_accessed=2 * nbytes
        ),
        **call_kwargs,
    )(x2d)


# ---------------------------------------------------------------------------
# Tiling plan
# ---------------------------------------------------------------------------
def _round_up(x, m):
    return ((x + m - 1) // m) * m


def _sublane_multiple(dtype):
    # f32 -> 8, bf16/f16 -> 16, int8/fp8 -> 32 (dtype-aware sublane packing).
    itemsize = jnp.dtype(dtype).itemsize
    return max(8, 32 // max(1, itemsize))


_SAFE_BLOCK_BYTES = 2 * 1024 * 1024    # fits every generation's scoped default
_BIG_BLOCK_BYTES = 4 * 1024 * 1024     # needs the explicit 32 MiB limit below
_RAISED_VMEM_LIMIT = 32 * 1024 * 1024  # <= physical VMEM on v5e/v6e/v7x


def _block_budget():
    """Return (max_block_bytes, vmem_limit_bytes_or_None), generation aware."""
    try:
        info = pltpu.get_tpu_info()
        phys_vmem = int(getattr(info, "vmem_capacity_bytes", 0) or 0)
    except Exception:
        phys_vmem = 0
    if phys_vmem >= 2 * _RAISED_VMEM_LIMIT:
        # v5e/v6e (128 MiB) and v7x (64 MiB) all land here: 4 MiB blocks,
        # double-buffered in + out = 16 MiB, explicit 32 MiB scoped limit.
        return _BIG_BLOCK_BYTES, _RAISED_VMEM_LIMIT
    # Unknown hardware: 2 MiB blocks fit the default scoped VMEM everywhere.
    return _SAFE_BLOCK_BYTES, None


def _plan_slab(total, dtype, max_block_bytes):
    """Pad-free lane-dense factorization of `total` elements.

    Returns (rows, cols, tile_rows) with cols a multiple of 128 and tile_rows
    either a multiple of the dtype sublane packing or the full rows extent.
    The grid is cdiv(rows, tile_rows); a ragged last block is handled by
    Pallas masked stores.  Returns None if no pad-free factorization exists
    (caller falls back to a metadata-only reshape).
    """
    if total <= 0 or total % 128 != 0:
        return None
    sub = _sublane_multiple(dtype)
    itemsize = jnp.dtype(dtype).itemsize
    # Prefer wide, lane-dense columns: fewer grid steps, unmasked vst stores.
    for cols in (4096, 2048, 1024, 512, 256, 128):
        if total % cols:
            continue
        rows = total // cols
        # Largest sublane-aligned row tile inside the per-block VMEM budget.
        max_tile = max(sub, (max_block_bytes // (cols * itemsize)) // sub * sub)
        if rows <= max_tile:
            if rows >= 2 * sub:
                # Split into exactly 2 sublane-aligned blocks so the
                # "parallel" grid axis can use both TensorCores (v7x).
                tile_rows = _round_up(pl.cdiv(rows, 2), sub)
            else:
                tile_rows = rows  # full-extent block (always legal)
        else:
            tile_rows = max_tile  # big blocks, cdiv grid, masked ragged tail
        return rows, cols, tile_rows
    return None


# ---------------------------------------------------------------------------
# Forward (PyTorch View semantics)
# ---------------------------------------------------------------------------
def _resolve_shape(total, shape):
    shape = [int(s) for s in shape]
    if shape.count(-1) > 1:
        raise ValueError("only one dimension can be inferred (-1)")
    if -1 in shape:
        idx = shape.index(-1)
        known = 1
        for j, s in enumerate(shape):
            if j != idx:
                known *= s
        if known == 0 or total % known != 0:
            raise ValueError(f"cannot view {total} elements as {tuple(shape)}")
        shape[idx] = total // known
    prod = 1
    for s in shape:
        prod *= s
    if prod != total:
        raise ValueError(f"view shape {tuple(shape)} invalid for {total} elements")
    return tuple(shape)


def view_forward(x, *shape, materialize=False, donate_input=False):
    """Pallas-backed equivalent of PyTorch `View(*shape).forward(x)`.

    Default path is metadata-only (like .view() on a contiguous tensor): a
    plain reshape with zero HBM traffic.  Pass `materialize=True` to force the
    streamed Pallas copy (fresh output buffer); `donate_input=True` lets the
    copy alias the input buffer when the caller can donate it.
    """
    out_shape = _resolve_shape(x.size, shape)
    if not materialize:
        return jnp.reshape(x, out_shape)

    max_block_bytes, vmem_limit = _block_budget()
    plan = _plan_slab(x.size, x.dtype, max_block_bytes)
    if plan is None:
        # No pad-free lane-dense factorization (e.g. element count not a
        # multiple of 128, or zero-sized).  A free metadata reshape beats
        # zero-pad + copy + slice (3 extra HBM passes).
        return jnp.reshape(x, out_shape)

    rows, cols, tile_rows = plan
    # Row-major reshape to the lane-dense slab: same element order as a
    # contiguous torch tensor's .view(); no data movement added by us.
    slab = jnp.reshape(x, (rows, cols))
    copied = _pallas_copy_2d(
        slab, tile_rows, vmem_limit_bytes=vmem_limit, donate_input=donate_input
    )
    return jnp.reshape(copied, out_shape)


# ---------------------------------------------------------------------------
# Self-test
# ---------------------------------------------------------------------------
if __name__ == "__main__":
    key = jax.random.PRNGKey(0)
    k1, k2 = jax.random.split(key, 2)

    # Small NCHW-like activation: (N, C, H, W) = (2, 4, 16, 16).
    x = jax.random.normal(k1, (2, 4, 16, 16), dtype=jnp.float32)
    ref = jnp.reshape(x, (2, 4, 256))

    # Default path: metadata-only reshape (View(2, 4, -1) semantics).
    y_meta = jax.block_until_ready(view_forward(x, 2, 4, -1))
    assert y_meta.shape == ref.shape and y_meta.dtype == ref.dtype
    assert bool(jnp.all(y_meta == ref))

    # Materialized Pallas copy of the same view.
    y_copy = jax.block_until_ready(view_forward(x, 2, 4, -1, materialize=True))
    assert y_copy.shape == ref.shape and y_copy.dtype == ref.dtype
    assert bool(jnp.all(y_copy == ref))

    # Awkward row count -> exercises the cdiv grid (2 steps, masked ragged
    # tail): total = 4*4*33*16 = 8448 elements -> slab (33, 256), tile_rows 24.
    x2 = jax.random.normal(k2, (4, 4, 33, 16), dtype=jnp.float32)
    y2 = jax.block_until_ready(view_forward(x2, -1, 16, materialize=True))
    ref2 = jnp.reshape(x2, (-1, 16))
    assert y2.shape == ref2.shape and y2.dtype == ref2.dtype
    assert bool(jnp.all(y2 == ref2))

    # Sub-32-bit dtype (bf16 sublane packing = 16) through the copy path.
    xb = x.astype(jnp.bfloat16)
    yb = jax.block_until_ready(view_forward(xb, -1, 64, materialize=True))
    refb = jnp.reshape(xb, (-1, 64))
    assert yb.shape == refb.shape and yb.dtype == refb.dtype
    assert bool(jnp.all(yb == refb))

    print("KERNEL_OK")
</pallas_src>

<mosaic_0001>
module attributes {stable_mosaic.version = 11 : i64} {
  func.func @_copy_kernel(%arg0: i32, %arg1: memref<1x2048xf32, #tpu.memory_space<vmem>>, %arg2: memref<1x2048xf32, #tpu.memory_space<vmem>>) attributes {dimension_semantics = [#tpu.dimension_semantics<parallel>], iteration_bounds = array<i64: 1>, scalar_prefetch = 0 : i64, scratch_operands = 0 : i64, tpu.core_type = #tpu.core_type<tc>, window_params = [{transform_indices = @transform_0, window_bounds = array<i64: 1, 2048>}, {transform_indices = @transform_1, window_bounds = array<i64: 1, 2048>}]} {
    %c0 = arith.constant 0 : index
    %c0_0 = arith.constant 0 : index
    %0 = vector.load %arg1[%c0, %c0_0] : memref<1x2048xf32, #tpu.memory_space<vmem>>, vector<1x2048xf32>
    %c0_1 = arith.constant 0 : index
    %c0_2 = arith.constant 0 : index
    %1 = vector.load %arg2[%c0_1, %c0_2] : memref<1x2048xf32, #tpu.memory_space<vmem>>, vector<1x2048xf32>
    tpu.vector_store %arg2[%c0_1, %c0_2], %0 {strides = array<i32>} : memref<1x2048xf32, #tpu.memory_space<vmem>>, vector<1x2048xf32>,
    return
  }
  func.func @transform_0(%arg0: i32) -> (i32, i32) {
    %c0_i32 = arith.constant 0 : i32
    %c0_i32_0 = arith.constant 0 : i32
    return %arg0, %c0_i32 : i32, i32
  }
  func.func @transform_1(%arg0: i32) -> (i32, i32) {
    %c0_i32 = arith.constant 0 : i32
    %c0_i32_0 = arith.constant 0 : i32
    return %arg0, %c0_i32 : i32, i32
  }
}

</mosaic_0001>

<bundles_post_ra>
// kernel: tpu_custom_call.1
= control target key start
LH: loop header
LB: loop body
LE: loop exit
PB: predicated region body
PF: predicated region fallthrough
CT: control target
= control target key end

     0   :  { %6 = vsyncpa [#allocation3], 0  ;;  %s126_s0 = inlined_call_operand.hbm [shape: f32[1,2048], index: 0, kind: input, shape index: {}]   ;;  %s127_s1 = inlined_call_operand.hbm [shape: f32[1,2048], index: 1, kind: output, shape index: {}]  }
   0x1   :  { %7 = vsyncpa [#allocation4], 0  ;;  %s90_s6 = smov [#allocation2]   ;;  %s42_s10 = scalar_lea.hbm %s126_s0, 256 }
   0x2   :  { %s14_s7 = sshll.u32 %s90_s6, 4  ;;  %p43_p0 = scmp.ne.s32.totalorder %s126_s0, %s42_s10  ;;  %s15_s7 = int_to_ptr.vmem [resolvable:$true] %s14_s7 }
   0x3   :  { %p46_p1 = scmp.lt.u32.totalorder %s42_s10, %s126_s0 }
   0x5   :  { %p48_p2 = pnand %p46_p1, %p43_p0 }
   0x7   :  { %51 = shalt.err (!%p48_p2)
}
   0x8   :  { %s52_s15 = scalar_lea.vmem %s15_s7, 256  ;;  %p57_p4 = scmp.lt.s32.totalorder %s15_s7, %s15_s7 }
   0x9   :  { %p53_p3 = scmp.ne.s32.totalorder %s15_s7, %s52_s15  ;;  %p58_p5 = scmp.lt.s32.totalorder %s52_s15, %s52_s15 }
   0xb   :  { %p59_p6 = por %p58_p5, %p57_p4 }
   0xd   :  { %p60_p7 = pnand %p59_p6, %p53_p3 }
   0xf   :  { %63 = shalt.err (!%p60_p7)
}
  0x10   :  { %17 = dma.hbm_to_vmem [thread:$0]  %s126_s0, 256, %s15_s7, [#allocation3]  }
  0x11   :  { %86 = dma.done.wait [#allocation3], 256  }
  0x12   :  { %87 = vsyncadd [#allocation3], 4294967040  ;;  %s91_s18 = smov [#allocation5]   ;;  %v21_v0 = vld [vmem:[#allocation2] sm:$0xff]  ;;  %v22_v1 = vld [vmem:[#allocation2 + $0x8] sm:$0xff] }
  0x13   :  { %s31_s19 = sshll.u32 %s91_s18, 4  ;;  %23 = vst [vmem:[#allocation5] sm:$0xff] %v21_v0  ;;  %24 = vst [vmem:[#allocation5 + $0x8] sm:$0xff] %v22_v1  ;;  %s32_s19 = int_to_ptr.vmem [resolvable:$true] %s31_s19 }
  0x14   :  { %s64_s20 = scalar_lea.vmem %s32_s19, 256  ;;  %p69_p9 = scmp.lt.s32.totalorder %s32_s19, %s32_s19 }
  0x15   :  { %p65_p8 = scmp.ne.s32.totalorder %s32_s19, %s64_s20  ;;  %p70_p10 = scmp.lt.s32.totalorder %s64_s20, %s64_s20 }
  0x17   :  { %p71_p11 = por %p70_p10, %p69_p9 }
  0x19   :  { %p72_p12 = pnand %p71_p11, %p65_p8 }
  0x1b   :  { %75 = shalt.err (!%p72_p12)
}
  0x1c   :  { %s76_s0 = scalar_lea.hbm %s127_s1, 256 }
  0x1d   :  { %p77_p13 = scmp.ne.s32.totalorder %s127_s1, %s76_s0  ;;  %p80_p0 = scmp.lt.u32.totalorder %s76_s0, %s127_s1 }
  0x1f   :  { %p82_p1 = pnand %p80_p0, %p77_p13 }
  0x21   :  { %85 = shalt.err (!%p82_p1)
}
  0x22   :  { %34 = dma.vmem_to_hbm [thread:$0]  %s32_s19, 256, %s127_s1, [#allocation4]  }
  0x23   :  { %88 = dma.done.wait [#allocation4], 256  }
  0x24   :  { %89 = vsyncadd [#allocation4], 4294967040 }
  0x25   :  { %38 = vsyncpa [#allocation3], 1 }
  0x26   :  { %39 = vsyncpa [#allocation4], 1 }

</bundles_post_ra>
